<compile_context>
chip_gen: v5e
topology: v5e:2x2
jax: 0.10.0
libtpu: 0.0.40
codegen_flags: <defaults>
</compile_context>

<pallas_src>
import math

import jax
import jax.numpy as jnp
from jax.experimental import pallas as pl
from jax.experimental.pallas import tpu as pltpu


def _cdiv(a, b):
    return -(-a // b)


def _round_up(a, b):
    return _cdiv(a, b) * b


def _tpu_generation(default=5):
    """Best-effort TPU generation (5/6/7).  Conservative default keeps VMEM small."""
    try:
        kind = jax.devices()[0].device_kind.lower()
    except Exception:
        return default
    for marker, gen in (("v7", 7), ("7x", 7), ("v6", 6), ("v5", 5)):
        if marker in kind:
            return gen
    return default


def _update_q_kernel(rou_ref, p_ref, b_ref, x_ref, y_ref, o_ref):
    rou = rou_ref[0, 0]
    p = p_ref[...].astype(jnp.float32)
    b = b_ref[...].astype(jnp.float32)
    xv = x_ref[...].astype(jnp.float32)
    yv = y_ref[...].astype(jnp.float32)
    # Match the reference expression exactly (divide, not reciprocal-multiply).
    o_ref[...] = ((rou * b + p * xv - yv) / (rou + 1.0)).astype(o_ref.dtype)


_LANE_CANDIDATES = (2048, 1024, 512, 256, 128)


def update_q(P, B, x, y, rou, *, tile_bytes=None):
    """Pallas implementation of UpdateQ.forward.

    P, B, x, y: same-shape arrays (any rank, e.g. NCHW), streamed in native dtype.
    rou: python float or 0-d scalar (may be traced).
    """
    assert P.shape == B.shape == x.shape == y.shape, "operands must share a shape"
    orig_shape = P.shape
    out_dtype = jnp.result_type(P.dtype, B.dtype, x.dtype, y.dtype)
    total = math.prod(orig_shape)
    if total == 0:
        return jnp.zeros(orig_shape, out_dtype)

    gen = _tpu_generation()
    if tile_bytes is None:
        tile_bytes = {5: 1 << 20, 6: 3 << 20, 7: 4 << 20}.get(gen, 1 << 20)
    vmem_limit = {6: 64 << 20, 7: 48 << 20}.get(gen, None)

    itemsize = max(
        [jnp.dtype(a.dtype).itemsize for a in (P, B, x, y)]
        + [jnp.dtype(out_dtype).itemsize]
    )
    blk_elems = max(8 * 128, int(tile_bytes) // itemsize)

    # ---- pick a zero-copy layout (no padding, no output slicing) ----
    lanes = next((c for c in _LANE_CANDIDATES if total % c == 0), None)

    if lanes is not None:
        # 2-D lane-dense slab: free reshape, unmasked vst on full blocks.
        rows = total // lanes
        budget_rows = max(8, (blk_elems // lanes) // 8 * 8)
        tm = rows if rows <= budget_rows else budget_rows
        if gen == 7 and _cdiv(rows, tm) < 2 and rows > 8:
            # Give both v7x TensorCores at least one block.
            tm = _round_up(_cdiv(rows, 2), 8)
        slab_shape = (rows, lanes)
        grid = (_cdiv(rows, tm),)
        tile_spec = pl.BlockSpec((tm, lanes), lambda i: (i, 0))
    else:
        # 1-D flat path: Pallas masks the partial tail block.
        blk = max(8 * 128, (blk_elems // (8 * 128)) * (8 * 128))
        if gen == 7 and blk >= total and total > 2 * 8 * 128:
            blk = _round_up(_cdiv(total, 2), 8 * 128)
        if blk >= total:
            blk = total
        slab_shape = (total,)
        grid = (_cdiv(total, blk),)
        tile_spec = pl.BlockSpec((blk,), lambda i: (i,))

    slabs = [a.reshape(slab_shape) for a in (P, B, x, y)]
    rou_arr = jnp.full((1, 1), rou, dtype=jnp.float32)

    bytes_accessed = sum(
        int(a.size) * jnp.dtype(a.dtype).itemsize for a in (P, B, x, y)
    ) + total * jnp.dtype(out_dtype).itemsize

    out = pl.pallas_call(
        _update_q_kernel,
        out_shape=jax.ShapeDtypeStruct(slab_shape, out_dtype),
        grid=grid,
        in_specs=[
            pl.BlockSpec(memory_space=pltpu.MemorySpace.SMEM),  # rou scalar
            tile_spec,  # P
            tile_spec,  # B
            tile_spec,  # x
            tile_spec,  # y
        ],
        out_specs=tile_spec,
        compiler_params=pltpu.CompilerParams(
            dimension_semantics=("parallel",),
            vmem_limit_bytes=vmem_limit,
        ),
        cost_estimate=pl.CostEstimate(
            flops=4 * total, transcendentals=0, bytes_accessed=int(bytes_accessed)
        ),
    )(rou_arr, *slabs)

    return out.reshape(orig_shape)


if __name__ == "__main__":
    key = jax.random.PRNGKey(0)
    rou = 0.5

    def run_case(shape, subkey, dtype=jnp.float32, tol=1e-6, **kw):
        kP, kB, kx, ky = jax.random.split(subkey, 4)
        P = jax.random.normal(kP, shape, dtype=jnp.float32).astype(dtype)
        B = jax.random.normal(kB, shape, dtype=jnp.float32).astype(dtype)
        x = jax.random.normal(kx, shape, dtype=jnp.float32).astype(dtype)
        y = jax.random.normal(ky, shape, dtype=jnp.float32).astype(dtype)

        out = jax.block_until_ready(update_q(P, B, x, y, rou, **kw))
        ref = (
            (rou * B.astype(jnp.float32)
             + P.astype(jnp.float32) * x.astype(jnp.float32)
             - y.astype(jnp.float32)) / (rou + 1.0)
        ).astype(dtype)
        assert out.shape == shape and out.dtype == dtype
        assert jnp.allclose(
            out.astype(jnp.float32), ref.astype(jnp.float32), atol=tol, rtol=tol
        ), f"mismatch for {shape} {dtype}"

    k1, k2, k3, k4, k5 = jax.random.split(key, 5)
    # Small aligned NCHW case (2-D lane-dense fast path, single block).
    run_case((2, 4, 16, 16), k1)
    # Odd-sized case: 1-D flat path, single full-array block, no padding copies.
    run_case((2, 3, 17, 19), k2)
    # Multi-step grid with a masked partial last row-block (2-D fast path).
    run_case((5, 4, 32, 64), k3, tile_bytes=64 * 1024)
    # Multi-step 1-D grid with a masked partial tail block.
    run_case((3, 5, 17, 13), k4, tile_bytes=4 * 1024)
    # bf16 streamed end-to-end (halves HBM traffic vs upcasting in the wrapper).
    run_case((2, 4, 16, 16), k5, dtype=jnp.bfloat16, tol=5e-2)

    print("KERNEL_OK")
</pallas_src>

<mosaic_0001>
module attributes {stable_mosaic.version = 11 : i64} {
  func.func @_update_q_kernel(%arg0: i32, %arg1: memref<1x1xf32, #tpu.memory_space<smem>>, %arg2: memref<1x2048xf32, #tpu.memory_space<vmem>>, %arg3: memref<1x2048xf32, #tpu.memory_space<vmem>>, %arg4: memref<1x2048xf32, #tpu.memory_space<vmem>>, %arg5: memref<1x2048xf32, #tpu.memory_space<vmem>>, %arg6: memref<1x2048xf32, #tpu.memory_space<vmem>>) attributes {dimension_semantics = [#tpu.dimension_semantics<parallel>], iteration_bounds = array<i64: 1>, scalar_prefetch = 0 : i64, scratch_operands = 0 : i64, tpu.core_type = #tpu.core_type<tc>, window_params = [{transform_indices = @transform_0, window_bounds = array<i64: 1, 1>}, {transform_indices = @transform_1, window_bounds = array<i64: 1, 2048>}, {transform_indices = @transform_2, window_bounds = array<i64: 1, 2048>}, {transform_indices = @transform_3, window_bounds = array<i64: 1, 2048>}, {transform_indices = @transform_4, window_bounds = array<i64: 1, 2048>}, {transform_indices = @transform_5, window_bounds = array<i64: 1, 2048>}]} {
    %c0 = arith.constant 0 : index
    %c0_0 = arith.constant 0 : index
    %0 = memref.load %arg1[%c0, %c0_0] : memref<1x1xf32, #tpu.memory_space<smem>>
    %c0_1 = arith.constant 0 : index
    %c0_2 = arith.constant 0 : index
    %1 = vector.load %arg2[%c0_1, %c0_2] : memref<1x2048xf32, #tpu.memory_space<vmem>>, vector<1x2048xf32>
    %c0_3 = arith.constant 0 : index
    %c0_4 = arith.constant 0 : index
    %2 = vector.load %arg3[%c0_3, %c0_4] : memref<1x2048xf32, #tpu.memory_space<vmem>>, vector<1x2048xf32>
    %c0_5 = arith.constant 0 : index
    %c0_6 = arith.constant 0 : index
    %3 = vector.load %arg4[%c0_5, %c0_6] : memref<1x2048xf32, #tpu.memory_space<vmem>>, vector<1x2048xf32>
    %c0_7 = arith.constant 0 : index
    %c0_8 = arith.constant 0 : index
    %4 = vector.load %arg5[%c0_7, %c0_8] : memref<1x2048xf32, #tpu.memory_space<vmem>>, vector<1x2048xf32>
    %5 = vector.broadcast %0 : f32 to vector<1x2048xf32>
    %6 = arith.mulf %5, %2 : vector<1x2048xf32>
    %7 = arith.mulf %1, %3 : vector<1x2048xf32>
    %8 = arith.addf %6, %7 : vector<1x2048xf32>
    %9 = arith.subf %8, %4 : vector<1x2048xf32>
    %cst = arith.constant 1.000000e+00 : f32
    %10 = arith.addf %0, %cst : f32
    %11 = vector.broadcast %10 : f32 to vector<1x2048xf32>
    %12 = arith.divf %9, %11 : vector<1x2048xf32>
    %c0_9 = arith.constant 0 : index
    %c0_10 = arith.constant 0 : index
    %13 = vector.load %arg6[%c0_9, %c0_10] : memref<1x2048xf32, #tpu.memory_space<vmem>>, vector<1x2048xf32>
    tpu.vector_store %arg6[%c0_9, %c0_10], %12 {strides = array<i32>} : memref<1x2048xf32, #tpu.memory_space<vmem>>, vector<1x2048xf32>,
    return
  }
  func.func @transform_0(%arg0: i32) -> (i32, i32) {
    %c0_i32 = arith.constant 0 : i32
    %c0_i32_0 = arith.constant 0 : i32
    %c0_i32_1 = arith.constant 0 : i32
    return %c0_i32, %c0_i32_0 : i32, i32
  }
  func.func @transform_1(%arg0: i32) -> (i32, i32) {
    %c0_i32 = arith.constant 0 : i32
    %c0_i32_0 = arith.constant 0 : i32
    return %arg0, %c0_i32 : i32, i32
  }
  func.func @transform_2(%arg0: i32) -> (i32, i32) {
    %c0_i32 = arith.constant 0 : i32
    %c0_i32_0 = arith.constant 0 : i32
    return %arg0, %c0_i32 : i32, i32
  }
  func.func @transform_3(%arg0: i32) -> (i32, i32) {
    %c0_i32 = arith.constant 0 : i32
    %c0_i32_0 = arith.constant 0 : i32
    return %arg0, %c0_i32 : i32, i32
  }
  func.func @transform_4(%arg0: i32) -> (i32, i32) {
    %c0_i32 = arith.constant 0 : i32
    %c0_i32_0 = arith.constant 0 : i32
    return %arg0, %c0_i32 : i32, i32
  }
  func.func @transform_5(%arg0: i32) -> (i32, i32) {
    %c0_i32 = arith.constant 0 : i32
    %c0_i32_0 = arith.constant 0 : i32
    return %arg0, %c0_i32 : i32, i32
  }
}

</mosaic_0001>

<bundles_post_ra>
// kernel: tpu_custom_call.1
= control target key start
LH: loop header
LB: loop body
LE: loop exit
PB: predicated region body
PF: predicated region fallthrough
CT: control target
= control target key end

     0   :  { %11 = vsyncpa [#allocation4], 0  ;;  %s325_s0 = inlined_call_operand.<no memory space> [shape: f32[1,1], index: 0, kind: input, shape index: {}]   ;;  %s326_s1 = inlined_call_operand.hbm [shape: f32[1,2048], index: 1, kind: input, shape index: {}]   ;;  %s327_s2 = inlined_call_operand.hbm [shape: f32[1,2048], index: 2, kind: input, shape index: {}]   ;;  %s328_s3 = inlined_call_operand.hbm [shape: f32[1,2048], index: 3, kind: input, shape index: {}]   ;;  %s329_s4 = inlined_call_operand.hbm [shape: f32[1,2048], index: 4, kind: input, shape index: {}]   ;;  %s330_s5 = inlined_call_operand.hbm [shape: f32[1,2048], index: 5, kind: output, shape index: {}]  }
   0x1   :  { %12 = vsyncpa [#allocation7], 0 }
   0x2   :  { %13 = vsyncpa [#allocation10], 0  ;;  %s33_s20 = sshll.u32 %s327_s2, 4  ;;  %s34_s20 = int_to_ptr.hbm [resolvable:$true] %s33_s20 }
   0x3   :  { %14 = vsyncpa [#allocation5], 0  ;;  %s269_s21 = smov [#allocation6]   ;;  %s22_s25 = sshll.u32 %s326_s1, 4  ;;  %s23_s25 = int_to_ptr.hbm [resolvable:$true] %s22_s25 }
   0x4   :  { %s35_s22 = sshll.u32 %s269_s21, 4  ;;  %s270_s26 = smov [#allocation3]   ;;  %s36_s22 = int_to_ptr.vmem [resolvable:$true] %s35_s22 }
   0x5   :  { %38 = dma.hbm_to_vmem [thread:$0]  %s34_s20, 256, %s36_s22, [#allocation7]  }
   0x6   :  { %s24_s27 = sshll.u32 %s270_s26, 4  ;;  %s44_s30 = sshll.u32 %s328_s3, 4  ;;  %s25_s27 = int_to_ptr.vmem [resolvable:$true] %s24_s27  ;;  %s45_s30 = int_to_ptr.hbm [resolvable:$true] %s44_s30 }
   0x7   :  { %27 = dma.hbm_to_vmem [thread:$0]  %s23_s25, 256, %s25_s27, [#allocation4]  }
   0x8   :  { %s55_s7 = sshll.u32 %s329_s4, 4  ;;  %s271_s8 = smov [#allocation8]   ;;  %s56_s7 = int_to_ptr.hbm [resolvable:$true] %s55_s7 }
   0x9   :  { %s46_s9 = sshll.u32 %s271_s8, 4  ;;  %s272_s1 = smov [#allocation9]   ;;  %s47_s9 = int_to_ptr.vmem [resolvable:$true] %s46_s9 }
   0xa   :  { %49 = dma.hbm_to_vmem [thread:$0]  %s45_s30, 256, %s47_s9, [#allocation7]  }
   0xb   :  { %s57_s10 = sshll.u32 %s272_s1, 4  ;;  %s58_s10 = int_to_ptr.vmem [resolvable:$true] %s57_s10 }
   0xc   :  { %60 = dma.hbm_to_vmem [thread:$0]  %s56_s7, 256, %s58_s10, [#allocation10]  }
   0xd   :  { %261 = dma.done.wait [#allocation4], 256  }
   0xe   :  { %262 = vsyncadd [#allocation4], 4294967040 }
   0xf   :  { %263 = dma.done.wait [#allocation7], 512  }
  0x10   :  { %264 = vsyncadd [#allocation7], 4294966784 }
  0x11   :  { %265 = dma.done.wait [#allocation10], 256  }
  0x12   :  { %266 = vsyncadd [#allocation10], 4294967040  ;;  %s95_s12 = sadd.f32 1.0, %s325_s0  ;;  %v86_v1 = vstv %s325_s0  ;;  %v78_v2 = vld [vmem:[#allocation3] sm:$0xff]  ;;  %v80_v3 = vld [vmem:[#allocation6] sm:$0xff]  ;;  %s273_s0 = smov [#allocation11]  }
  0x13   :  { %v82_v4 = vld [vmem:[#allocation8] sm:$0xff]  ;;  %v87_v5 = vmul.f32 %v86_v1, %v80_v3  ;;  %v79_v7 = vld [vmem:[#allocation3 + $0x8] sm:$0xff]  ;;  %v81_v8 = vld [vmem:[#allocation6 + $0x8] sm:$0xff]  ;;  %s120_s14 = sshll.u32 %s273_s0, 4  ;;  %s122_s17 = sshll.u32 %s330_s5, 4  ;;  %s121_s14 = int_to_ptr.vmem [resolvable:$true] %s120_s14  ;;  %s123_s17 = int_to_ptr.hbm [resolvable:$true] %s122_s17 }
  0x14   :  { %v96_v0 = vstv %s95_s12  ;;  %v89_v6 = vmul.f32 %v82_v4, %v78_v2  ;;  %v83_v10 = vld [vmem:[#allocation8 + $0x8] sm:$0xff]  ;;  %v88_v11 = vmul.f32 %v86_v1, %v81_v8  ;;  %v84_v19 = vld [vmem:[#allocation9] sm:$0xff]  ;;  %v85_v20 = vld [vmem:[#allocation9 + $0x8] sm:$0xff] }
  0x15   :  { %139 = vrcp.f32 %v96_v0  ;;  %v90_v13 = vmul.f32 %v83_v10, %v79_v7  ;;  %vm102_vm0 = vweird.f32 %v96_v0  ;;  %v106_v14 = vand.u32 2147483647, %v96_v0 }
  0x16   :  { %v108_v15 = vand.u32 2147483648, %v96_v0  ;;  %v91_v16 = vadd.f32 %v89_v6, %v87_v5 }
  0x17   :  { %v92_v18 = vadd.f32 %v90_v13, %v88_v11  ;;  %vm107_vm3 = vcmp.eq.f32.partialorder %v106_v14, 8.507059e+37 }
  0x18   :  { %v109_v22 = vor.u32 1.1754944e-38, %v108_v15  ;;  %v93_v23 = vsub.f32 %v91_v16, %v84_v19 }
  0x19   :  { %v94_v25 = vsub.f32 %v92_v18, %v85_v20 }
  0x1b   :  { %v140_v9 = vpop.eup %139 }
  0x1c   :  { %v98_v12 = vmul.f32 %v140_v9, %v96_v0  ;;  %vm103_vm1 = vweird.f32 %v140_v9 }
  0x1d   :  { %vm104_vm2 = vmor %vm102_vm0, %vm103_vm1 }
  0x1e   :  { %v99_v17 = vsub.f32 1.0, %v98_v12 }
  0x20   :  { %v100_v21 = vmul.f32 %v140_v9, %v99_v17 }
  0x22   :  { %v101_v24 = vadd.f32 %v140_v9, %v100_v21 }
  0x24   :  { %v105_v26 = vsel %vm104_vm2, %v140_v9, %v101_v24 }
  0x25   :  { %v110_v27 = vsel %vm107_vm3, %v109_v22, %v105_v26 }
  0x26   :  { %v111_v28 = vmul.f32 %v110_v27, %v93_v23  ;;  %v112_v29 = vmul.f32 %v110_v27, %v94_v25 }
  0x28   :  { %113 = vst [vmem:[#allocation11] sm:$0xff] %v111_v28 }
  0x29   :  { %114 = vst [vmem:[#allocation11 + $0x8] sm:$0xff] %v112_v29 }
  0x2a   :  { %125 = dma.vmem_to_hbm [thread:$0]  %s121_s14, 256, %s123_s17, [#allocation5]  }
  0x2b   :  { %267 = dma.done.wait [#allocation5], 256  }
  0x2c   :  { %268 = vsyncadd [#allocation5], 4294967040 }
  0x2d   :  { %130 = vsyncpa [#allocation4], 1 }
  0x2e   :  { %131 = vsyncpa [#allocation7], 1 }
  0x2f   :  { %132 = vsyncpa [#allocation10], 1 }
  0x30   :  { %133 = vsyncpa [#allocation5], 1 }

</bundles_post_ra>
